<compile_context>
chip_gen: v7x
topology: tpu7x:2x2x1
jax: 0.10.0
libtpu: 0.0.40
codegen_flags: <defaults>
</compile_context>

<pallas_src>
import math
import functools

import numpy as np
import jax
import jax.numpy as jnp
from jax.experimental import pallas as pl
from jax.experimental.pallas import tpu as pltpu


# ------------------------------- Pallas kernel -------------------------------

def _evaluator_kernel(t_smem, r_smem,              # SMEM (16,) f32: transform / realign, row-major
                      gt_T_ref, est_T_ref,         # VMEM (4,4) f32
                      gt_ref_idx, gt_src_idx,      # VMEM (G,1) int32
                      gt_ovl,                      # VMEM (G,1) f32
                      pred_ref_idx, pred_src_idx,  # VMEM (1,P) int32
                      ref_t, src_t,                # VMEM (3,N) f32  (coords on sublanes, points on lanes)
                      pts_t,                       # VMEM (3,M) f32
                      out_ref,                     # VMEM (1,8) f32
                      *, overlap_thresh, radius_sq, rmse_thresh,
                      inv_p, inv_n, inv_m):
    # ---------------- coarse precision (PIR) ----------------
    # "does predicted pair i match ANY valid gt pair" via a broadcast compare.
    valid = gt_ovl[...] > overlap_thresh                              # (G,1) bool
    same = (gt_ref_idx[...] == pred_ref_idx[...]) & \
           (gt_src_idx[...] == pred_src_idx[...]) & valid             # (G,P) bool
    hit = jnp.max(same.astype(jnp.int32), axis=0, keepdims=True)      # (1,P) in {0,1}
    pir = jnp.sum(hit.astype(jnp.float32), axis=1, keepdims=True) * inv_p   # (1,1)

    # ---------------- fine precision (IR) ----------------
    sx = src_t[0:1, :]; sy = src_t[1:2, :]; sz = src_t[2:3, :]        # (1,N)
    wx = t_smem[0] * sx + t_smem[1] * sy + t_smem[2] * sz + t_smem[3]
    wy = t_smem[4] * sx + t_smem[5] * sy + t_smem[6] * sz + t_smem[7]
    wz = t_smem[8] * sx + t_smem[9] * sy + t_smem[10] * sz + t_smem[11]
    dx = ref_t[0:1, :] - wx
    dy = ref_t[1:2, :] - wy
    dz = ref_t[2:3, :] - wz
    d2 = dx * dx + dy * dy + dz * dz                                  # (1,N)
    hits = (d2 < radius_sq).astype(jnp.float32)                       # dist < r  <=>  dist^2 < r^2
    ir = jnp.sum(hits, axis=1, keepdims=True) * inv_n                 # (1,1)

    # ---------------- registration: RRE (cosine) and RTE ----------------
    rows = jax.lax.broadcasted_iota(jnp.int32, (4, 4), 0)
    cols = jax.lax.broadcasted_iota(jnp.int32, (4, 4), 1)
    rot_mask = ((rows < 3) & (cols < 3)).astype(jnp.float32)
    trans_mask = ((rows < 3) & (cols == 3)).astype(jnp.float32)

    gt = gt_T_ref[...]
    est = est_T_ref[...]

    # trace(R_gt^T @ R_est) == sum(R_gt * R_est) elementwise over the 3x3 block
    tr = jnp.sum(jnp.sum(gt * est * rot_mask, axis=1, keepdims=True),
                 axis=0, keepdims=True)                               # (1,1)
    cos_rre = jnp.clip(0.5 * (tr - 1.0), -1.0, 1.0)                   # arccos applied outside

    dt = (gt - est) * trans_mask
    rte = jnp.sqrt(jnp.sum(jnp.sum(dt * dt, axis=1, keepdims=True),
                           axis=0, keepdims=True))                    # (1,1)

    # ---------------- registration: RMSE / RR ----------------
    px = pts_t[0:1, :]; py = pts_t[1:2, :]; pz = pts_t[2:3, :]        # (1,M)
    qx = r_smem[0] * px + r_smem[1] * py + r_smem[2] * pz + r_smem[3]
    qy = r_smem[4] * px + r_smem[5] * py + r_smem[6] * pz + r_smem[7]
    qz = r_smem[8] * px + r_smem[9] * py + r_smem[10] * pz + r_smem[11]
    ex = qx - px
    ey = qy - py
    ez = qz - pz
    dist = jnp.sqrt(ex * ex + ey * ey + ez * ez)                      # (1,M)
    rmse = jnp.sum(dist, axis=1, keepdims=True) * inv_m               # (1,1)
    rr = (rmse < rmse_thresh).astype(jnp.float32)                     # (1,1)

    # ---------------- pack all metrics into one lane-aligned slab ----------------
    lane = jax.lax.broadcasted_iota(jnp.int32, (1, 8), 1)
    zero = jnp.zeros((1, 8), jnp.float32)
    out = jnp.where(lane == 0, pir, zero)
    out = out + jnp.where(lane == 1, ir, zero)
    out = out + jnp.where(lane == 2, cos_rre, zero)
    out = out + jnp.where(lane == 3, rte, zero)
    out = out + jnp.where(lane == 4, rmse, zero)
    out = out + jnp.where(lane == 5, rr, zero)
    out_ref[...] = out


# ---------------------------------- glue --------------------------------------

_SMEM_SPEC = pl.BlockSpec(memory_space=pltpu.MemorySpace.SMEM)
_VMEM_SPEC = pl.BlockSpec(memory_space=pltpu.MemorySpace.VMEM)


def _fused_metrics(pred_ref, pred_src, gt_idx, gt_ovl,
                   ref_corr, src_corr, src_points,
                   transform, est_transform, *,
                   overlap_thresh, radius, rmse_thresh):
    P = int(pred_ref.shape[0])
    G = int(gt_idx.shape[0])
    N = int(ref_corr.shape[0])
    M = int(src_points.shape[0])

    transform = transform.astype(jnp.float32)
    est_transform = est_transform.astype(jnp.float32)

    # Closed-form SE(3) inverse (exact; avoids an LU-solve kernel for a 4x4).
    R = transform[:3, :3]
    t = transform[:3, 3]
    Rt = R.T
    inv_T = jnp.concatenate(
        [jnp.concatenate([Rt, (-(Rt @ t))[:, None]], axis=1),
         jnp.array([[0.0, 0.0, 0.0, 1.0]], jnp.float32)], axis=0)
    realign = inv_T @ est_transform

    kernel = functools.partial(
        _evaluator_kernel,
        overlap_thresh=float(overlap_thresh),
        radius_sq=float(radius) ** 2,
        rmse_thresh=float(rmse_thresh),
        # guard against empty correspondence sets (would otherwise produce inf/nan)
        inv_p=1.0 / max(P, 1),
        inv_n=1.0 / max(N, 1),
        inv_m=1.0 / max(M, 1))

    out = pl.pallas_call(
        kernel,
        out_shape=jax.ShapeDtypeStruct((1, 8), jnp.float32),
        in_specs=[_SMEM_SPEC, _SMEM_SPEC] + [_VMEM_SPEC] * 10,
        out_specs=_VMEM_SPEC,
    )(transform.reshape(16), realign.reshape(16),
      transform, est_transform,
      gt_idx[:, 0].astype(jnp.int32).reshape(G, 1),
      gt_idx[:, 1].astype(jnp.int32).reshape(G, 1),
      gt_ovl.astype(jnp.float32).reshape(G, 1),
      pred_ref.astype(jnp.int32).reshape(1, P),
      pred_src.astype(jnp.int32).reshape(1, P),
      ref_corr.astype(jnp.float32).T,      # (3, N) — points on lanes
      src_corr.astype(jnp.float32).T,      # (3, N)
      src_points.astype(jnp.float32).T)    # (3, M)

    rre = jnp.degrees(jnp.arccos(out[0, 2]))
    return {'PIR': out[0, 0], 'IR': out[0, 1], 'RRE': rre,
            'RTE': out[0, 3], 'RMSE': out[0, 4], 'RR': out[0, 5]}


class Evaluator:
    def __init__(self, acceptance_overlap, acceptance_radius, rmse_threshold):
        self.acceptance_overlap = float(acceptance_overlap)
        self.acceptance_radius = float(acceptance_radius)
        self.acceptance_rmse = float(rmse_threshold)
        # One jitted graph: glue ops + single pallas_call + arccos.
        self._fn = jax.jit(functools.partial(
            _fused_metrics,
            overlap_thresh=self.acceptance_overlap,
            radius=self.acceptance_radius,
            rmse_thresh=self.acceptance_rmse))

    def __call__(self, output_dict, data_dict):
        return self._fn(
            output_dict['ref_node_corr_indices'],
            output_dict['src_node_corr_indices'],
            output_dict['gt_node_corr_indices'],
            output_dict['gt_node_corr_overlaps'],
            output_dict['ref_corr_points'],
            output_dict['src_corr_points'],
            output_dict['src_points'],
            data_dict['transform'],
            output_dict['estimated_transform'])


# ------------------------------ reference (numpy) -----------------------------

def _numpy_reference(output_dict, data_dict, ov_thr, radius, rmse_thr):
    f = lambda x: np.asarray(x)
    ref_len = f(output_dict['ref_points_c']).shape[0]
    src_len = f(output_dict['src_points_c']).shape[0]
    gt_idx = f(output_dict['gt_node_corr_indices'])
    gt_ovl = f(output_dict['gt_node_corr_overlaps'])
    masks = gt_ovl > ov_thr
    gi = gt_idx[masks]
    gmap = np.zeros((ref_len, src_len), np.float32)
    gmap[gi[:, 0], gi[:, 1]] = 1.0
    pir = gmap[f(output_dict['ref_node_corr_indices']),
               f(output_dict['src_node_corr_indices'])].mean()

    T = f(data_dict['transform'])
    R, t = T[:3, :3], T[:3, 3]
    ref_c = f(output_dict['ref_corr_points'])
    src_c = f(output_dict['src_corr_points']) @ R.T + t
    ir = (np.linalg.norm(ref_c - src_c, axis=1) < radius).astype(np.float32).mean()

    E = f(output_dict['estimated_transform'])
    Re, te = E[:3, :3], E[:3, 3]
    tr = np.trace(R.T @ Re)
    rre = np.degrees(np.arccos(np.clip(0.5 * (tr - 1.0), -1.0, 1.0)))
    rte = np.linalg.norm(t - te)
    realign = np.linalg.inv(T) @ E
    sp = f(output_dict['src_points'])
    sp_r = sp @ realign[:3, :3].T + realign[:3, 3]
    rmse = np.linalg.norm(sp_r - sp, axis=1).mean()
    rr = float(rmse < rmse_thr)
    return dict(PIR=pir, IR=ir, RRE=rre, RTE=rte, RMSE=rmse, RR=rr)


# --------------------------------- main ---------------------------------------

def _make_rigid(angle_deg, axis, translation):
    axis = np.asarray(axis, np.float64)
    axis = axis / np.linalg.norm(axis)
    a = math.radians(angle_deg)
    K = np.array([[0.0, -axis[2], axis[1]],
                  [axis[2], 0.0, -axis[0]],
                  [-axis[1], axis[0], 0.0]])
    R = np.eye(3) + math.sin(a) * K + (1.0 - math.cos(a)) * (K @ K)
    T = np.eye(4)
    T[:3, :3] = R
    T[:3, 3] = translation
    return jnp.asarray(T, jnp.float32)


if __name__ == "__main__":
    key = jax.random.PRNGKey(0)
    ks = jax.random.split(key, 10)

    ref_len_c, src_len_c = 16, 20
    G, P, N, M = 24, 16, 32, 64

    transform = _make_rigid(10.0, [0.2, 0.3, 1.0], [0.10, -0.05, 0.20])
    est_transform = _make_rigid(11.0, [0.2, 0.3, 1.0], [0.12, -0.04, 0.21])

    ref_points_c = jax.random.normal(ks[0], (ref_len_c, 3), jnp.float32)
    src_points_c = jax.random.normal(ks[1], (src_len_c, 3), jnp.float32)

    gt_node_corr_indices = jnp.stack(
        [jax.random.randint(ks[2], (G,), 0, ref_len_c),
         jax.random.randint(ks[3], (G,), 0, src_len_c)], axis=1).astype(jnp.int32)
    gt_node_corr_overlaps = jax.random.uniform(ks[4], (G,), jnp.float32)
    ref_node_corr_indices = jax.random.randint(ks[5], (P,), 0, ref_len_c).astype(jnp.int32)
    src_node_corr_indices = jax.random.randint(ks[6], (P,), 0, src_len_c).astype(jnp.int32)

    ref_corr_points = jax.random.normal(ks[7], (N, 3), jnp.float32)
    R_np = np.asarray(transform[:3, :3])
    t_np = np.asarray(transform[:3, 3])
    src_corr_points = jnp.asarray(
        (np.asarray(ref_corr_points) - t_np) @ R_np, jnp.float32)
    src_corr_points = src_corr_points + 0.05 * jax.random.normal(ks[8], (N, 3), jnp.float32)

    src_points = jax.random.normal(ks[9], (M, 3), jnp.float32)

    output_dict = {
        'ref_points_c': ref_points_c,
        'src_points_c': src_points_c,
        'gt_node_corr_indices': gt_node_corr_indices,
        'gt_node_corr_overlaps': gt_node_corr_overlaps,
        'ref_node_corr_indices': ref_node_corr_indices,
        'src_node_corr_indices': src_node_corr_indices,
        'ref_corr_points': ref_corr_points,
        'src_corr_points': src_corr_points,
        'estimated_transform': est_transform,
        'src_points': src_points,
    }
    data_dict = {'transform': transform}

    evaluator = Evaluator(acceptance_overlap=0.1, acceptance_radius=0.1,
                          rmse_threshold=0.2)
    result = evaluator(output_dict, data_dict)
    result = jax.block_until_ready(result)

    ref = _numpy_reference(output_dict, data_dict, 0.1, 0.1, 0.2)
    for name in ('PIR', 'IR', 'RRE', 'RTE', 'RMSE', 'RR'):
        got = float(result[name])
        want = float(ref[name])
        assert np.isfinite(got), f"{name} is not finite: {got}"
        assert abs(got - want) <= 1e-2 + 1e-3 * abs(want), \
            f"{name}: kernel={got} reference={want}"

    print("KERNEL_OK")
</pallas_src>

<mosaic_0001>
module attributes {stable_mosaic.version = 11 : i64} {
  func.func @_evaluator_kernel(%arg0: memref<16xf32, #tpu.memory_space<smem>>, %arg1: memref<16xf32, #tpu.memory_space<smem>>, %arg2: memref<4x4xf32, #tpu.memory_space<vmem>>, %arg3: memref<4x4xf32, #tpu.memory_space<vmem>>, %arg4: memref<24x1xi32, #tpu.memory_space<vmem>>, %arg5: memref<24x1xi32, #tpu.memory_space<vmem>>, %arg6: memref<24x1xf32, #tpu.memory_space<vmem>>, %arg7: memref<1x16xi32, #tpu.memory_space<vmem>>, %arg8: memref<1x16xi32, #tpu.memory_space<vmem>>, %arg9: memref<3x32xf32, #tpu.memory_space<vmem>>, %arg10: memref<3x32xf32, #tpu.memory_space<vmem>>, %arg11: memref<3x64xf32, #tpu.memory_space<vmem>>, %arg12: memref<1x8xf32, #tpu.memory_space<vmem>>) attributes {dimension_semantics = [], scalar_prefetch = 0 : i64, scratch_operands = 0 : i64, tpu.core_type = #tpu.core_type<tc>} {
    %c0 = arith.constant 0 : index
    %c0_0 = arith.constant 0 : index
    %0 = vector.load %arg6[%c0, %c0_0] : memref<24x1xf32, #tpu.memory_space<vmem>>, vector<24x1xf32>
    %cst = arith.constant 1.000000e-01 : f32
    %1 = vector.broadcast %cst : f32 to vector<24x1xf32>
    %2 = arith.cmpf ogt, %0, %1 : vector<24x1xf32>
    %c0_1 = arith.constant 0 : index
    %c0_2 = arith.constant 0 : index
    %3 = vector.load %arg4[%c0_1, %c0_2] : memref<24x1xi32, #tpu.memory_space<vmem>>, vector<24x1xi32>
    %c0_3 = arith.constant 0 : index
    %c0_4 = arith.constant 0 : index
    %4 = vector.load %arg7[%c0_3, %c0_4] : memref<1x16xi32, #tpu.memory_space<vmem>>, vector<1x16xi32>
    %5 = vector.broadcast %3 : vector<24x1xi32> to vector<24x16xi32>
    %6 = vector.broadcast %4 : vector<1x16xi32> to vector<24x16xi32>
    %7 = arith.cmpi eq, %5, %6 : vector<24x16xi32>
    %c0_5 = arith.constant 0 : index
    %c0_6 = arith.constant 0 : index
    %8 = vector.load %arg5[%c0_5, %c0_6] : memref<24x1xi32, #tpu.memory_space<vmem>>, vector<24x1xi32>
    %c0_7 = arith.constant 0 : index
    %c0_8 = arith.constant 0 : index
    %9 = vector.load %arg8[%c0_7, %c0_8] : memref<1x16xi32, #tpu.memory_space<vmem>>, vector<1x16xi32>
    %10 = vector.broadcast %8 : vector<24x1xi32> to vector<24x16xi32>
    %11 = vector.broadcast %9 : vector<1x16xi32> to vector<24x16xi32>
    %12 = arith.cmpi eq, %10, %11 : vector<24x16xi32>
    %13 = arith.andi %7, %12 : vector<24x16xi1>
    %14 = vector.broadcast %2 : vector<24x1xi1> to vector<24x16xi1>
    %15 = arith.andi %13, %14 : vector<24x16xi1>
    %16 = arith.extui %15 : vector<24x16xi1> to vector<24x16xi32>
    %cst_9 = arith.constant dense<-2147483648> : vector<16xi32>
    %17 = vector.multi_reduction <maxsi>, %16, %cst_9 [0] : vector<24x16xi32> to vector<16xi32>
    %18 = vector.shape_cast %17 : vector<16xi32> to vector<1x16xi32>
    %19 = arith.sitofp %18 : vector<1x16xi32> to vector<1x16xf32>
    %cst_10 = arith.constant dense<0.000000e+00> : vector<1xf32>
    %20 = vector.multi_reduction <add>, %19, %cst_10 [1] : vector<1x16xf32> to vector<1xf32>
    %21 = vector.shape_cast %20 : vector<1xf32> to vector<1x1xf32>
    %cst_11 = arith.constant 6.250000e-02 : f32
    %22 = vector.broadcast %cst_11 : f32 to vector<1x1xf32>
    %23 = arith.mulf %21, %22 : vector<1x1xf32>
    %c0_12 = arith.constant 0 : index
    %c0_13 = arith.constant 0 : index
    %24 = vector.load %arg10[%c0_12, %c0_13] : memref<3x32xf32, #tpu.memory_space<vmem>>, vector<1x32xf32>
    %c1 = arith.constant 1 : index
    %c0_14 = arith.constant 0 : index
    %25 = vector.load %arg10[%c1, %c0_14] : memref<3x32xf32, #tpu.memory_space<vmem>>, vector<1x32xf32>
    %c2 = arith.constant 2 : index
    %c0_15 = arith.constant 0 : index
    %26 = vector.load %arg10[%c2, %c0_15] : memref<3x32xf32, #tpu.memory_space<vmem>>, vector<1x32xf32>
    %c0_16 = arith.constant 0 : index
    %27 = memref.load %arg0[%c0_16] : memref<16xf32, #tpu.memory_space<smem>>
    %28 = vector.broadcast %27 : f32 to vector<1x32xf32>
    %29 = arith.mulf %28, %24 : vector<1x32xf32>
    %c1_17 = arith.constant 1 : index
    %30 = memref.load %arg0[%c1_17] : memref<16xf32, #tpu.memory_space<smem>>
    %31 = vector.broadcast %30 : f32 to vector<1x32xf32>
    %32 = arith.mulf %31, %25 : vector<1x32xf32>
    %33 = arith.addf %29, %32 : vector<1x32xf32>
    %c2_18 = arith.constant 2 : index
    %34 = memref.load %arg0[%c2_18] : memref<16xf32, #tpu.memory_space<smem>>
    %35 = vector.broadcast %34 : f32 to vector<1x32xf32>
    %36 = arith.mulf %35, %26 : vector<1x32xf32>
    %37 = arith.addf %33, %36 : vector<1x32xf32>
    %c3 = arith.constant 3 : index
    %38 = memref.load %arg0[%c3] : memref<16xf32, #tpu.memory_space<smem>>
    %39 = vector.broadcast %38 : f32 to vector<1x32xf32>
    %40 = arith.addf %37, %39 : vector<1x32xf32>
    %c4 = arith.constant 4 : index
    %41 = memref.load %arg0[%c4] : memref<16xf32, #tpu.memory_space<smem>>
    %42 = vector.broadcast %41 : f32 to vector<1x32xf32>
    %43 = arith.mulf %42, %24 : vector<1x32xf32>
    %c5 = arith.constant 5 : index
    %44 = memref.load %arg0[%c5] : memref<16xf32, #tpu.memory_space<smem>>
    %45 = vector.broadcast %44 : f32 to vector<1x32xf32>
    %46 = arith.mulf %45, %25 : vector<1x32xf32>
    %47 = arith.addf %43, %46 : vector<1x32xf32>
    %c6 = arith.constant 6 : index
    %48 = memref.load %arg0[%c6] : memref<16xf32, #tpu.memory_space<smem>>
    %49 = vector.broadcast %48 : f32 to vector<1x32xf32>
    %50 = arith.mulf %49, %26 : vector<1x32xf32>
    %51 = arith.addf %47, %50 : vector<1x32xf32>
    %c7 = arith.constant 7 : index
    %52 = memref.load %arg0[%c7] : memref<16xf32, #tpu.memory_space<smem>>
    %53 = vector.broadcast %52 : f32 to vector<1x32xf32>
    %54 = arith.addf %51, %53 : vector<1x32xf32>
    %c8 = arith.constant 8 : index
    %55 = memref.load %arg0[%c8] : memref<16xf32, #tpu.memory_space<smem>>
    %56 = vector.broadcast %55 : f32 to vector<1x32xf32>
    %57 = arith.mulf %56, %24 : vector<1x32xf32>
    %c9 = arith.constant 9 : index
    %58 = memref.load %arg0[%c9] : memref<16xf32, #tpu.memory_space<smem>>
    %59 = vector.broadcast %58 : f32 to vector<1x32xf32>
    %60 = arith.mulf %59, %25 : vector<1x32xf32>
    %61 = arith.addf %57, %60 : vector<1x32xf32>
    %c10 = arith.constant 10 : index
    %62 = memref.load %arg0[%c10] : memref<16xf32, #tpu.memory_space<smem>>
    %63 = vector.broadcast %62 : f32 to vector<1x32xf32>
    %64 = arith.mulf %63, %26 : vector<1x32xf32>
    %65 = arith.addf %61, %64 : vector<1x32xf32>
    %c11 = arith.constant 11 : index
    %66 = memref.load %arg0[%c11] : memref<16xf32, #tpu.memory_space<smem>>
    %67 = vector.broadcast %66 : f32 to vector<1x32xf32>
    %68 = arith.addf %65, %67 : vector<1x32xf32>
    %c0_19 = arith.constant 0 : index
    %c0_20 = arith.constant 0 : index
    %69 = vector.load %arg9[%c0_19, %c0_20] : memref<3x32xf32, #tpu.memory_space<vmem>>, vector<1x32xf32>
    %70 = arith.subf %69, %40 : vector<1x32xf32>
    %c1_21 = arith.constant 1 : index
    %c0_22 = arith.constant 0 : index
    %71 = vector.load %arg9[%c1_21, %c0_22] : memref<3x32xf32, #tpu.memory_space<vmem>>, vector<1x32xf32>
    %72 = arith.subf %71, %54 : vector<1x32xf32>
    %c2_23 = arith.constant 2 : index
    %c0_24 = arith.constant 0 : index
    %73 = vector.load %arg9[%c2_23, %c0_24] : memref<3x32xf32, #tpu.memory_space<vmem>>, vector<1x32xf32>
    %74 = arith.subf %73, %68 : vector<1x32xf32>
    %75 = arith.mulf %70, %70 : vector<1x32xf32>
    %76 = arith.mulf %72, %72 : vector<1x32xf32>
    %77 = arith.addf %75, %76 : vector<1x32xf32>
    %78 = arith.mulf %74, %74 : vector<1x32xf32>
    %79 = arith.addf %77, %78 : vector<1x32xf32>
    %cst_25 = arith.constant 0.00999999977 : f32
    %80 = vector.broadcast %cst_25 : f32 to vector<1x32xf32>
    %81 = arith.cmpf olt, %79, %80 : vector<1x32xf32>
    %82 = arith.extui %81 : vector<1x32xi1> to vector<1x32xi32>
    %83 = arith.sitofp %82 : vector<1x32xi32> to vector<1x32xf32>
    %cst_26 = arith.constant dense<0.000000e+00> : vector<1xf32>
    %84 = vector.multi_reduction <add>, %83, %cst_26 [1] : vector<1x32xf32> to vector<1xf32>
    %85 = vector.shape_cast %84 : vector<1xf32> to vector<1x1xf32>
    %cst_27 = arith.constant 3.125000e-02 : f32
    %86 = vector.broadcast %cst_27 : f32 to vector<1x1xf32>
    %87 = arith.mulf %85, %86 : vector<1x1xf32>
    %88 = tpu.iota {dimensions = array<i32: 0>} : vector<4x4xi32>
    %89 = tpu.iota {dimensions = array<i32: 1>} : vector<4x4xi32>
    %c3_i32 = arith.constant 3 : i32
    %90 = vector.broadcast %c3_i32 : i32 to vector<4x4xi32>
    %91 = arith.cmpi slt, %88, %90 : vector<4x4xi32>
    %c3_i32_28 = arith.constant 3 : i32
    %92 = vector.broadcast %c3_i32_28 : i32 to vector<4x4xi32>
    %93 = arith.cmpi slt, %89, %92 : vector<4x4xi32>
    %94 = arith.andi %91, %93 : vector<4x4xi1>
    %95 = arith.extui %94 : vector<4x4xi1> to vector<4x4xi32>
    %96 = arith.sitofp %95 : vector<4x4xi32> to vector<4x4xf32>
    %c3_i32_29 = arith.constant 3 : i32
    %97 = vector.broadcast %c3_i32_29 : i32 to vector<4x4xi32>
    %98 = arith.cmpi slt, %88, %97 : vector<4x4xi32>
    %c3_i32_30 = arith.constant 3 : i32
    %99 = vector.broadcast %c3_i32_30 : i32 to vector<4x4xi32>
    %100 = arith.cmpi eq, %89, %99 : vector<4x4xi32>
    %101 = arith.andi %98, %100 : vector<4x4xi1>
    %102 = arith.extui %101 : vector<4x4xi1> to vector<4x4xi32>
    %103 = arith.sitofp %102 : vector<4x4xi32> to vector<4x4xf32>
    %c0_31 = arith.constant 0 : index
    %c0_32 = arith.constant 0 : index
    %104 = vector.load %arg2[%c0_31, %c0_32] : memref<4x4xf32, #tpu.memory_space<vmem>>, vector<4x4xf32>
    %c0_33 = arith.constant 0 : index
    %c0_34 = arith.constant 0 : index
    %105 = vector.load %arg3[%c0_33, %c0_34] : memref<4x4xf32, #tpu.memory_space<vmem>>, vector<4x4xf32>
    %106 = arith.mulf %104, %105 : vector<4x4xf32>
    %107 = arith.mulf %106, %96 : vector<4x4xf32>
    %cst_35 = arith.constant dense<0.000000e+00> : vector<4xf32>
    %108 = vector.multi_reduction <add>, %107, %cst_35 [1] : vector<4x4xf32> to vector<4xf32>
    %109 = vector.shape_cast %108 : vector<4xf32> to vector<4x1xf32>
    %cst_36 = arith.constant dense<0.000000e+00> : vector<1xf32>
    %110 = vector.multi_reduction <add>, %109, %cst_36 [0] : vector<4x1xf32> to vector<1xf32>
    %111 = vector.shape_cast %110 : vector<1xf32> to vector<1x1xf32>
    %cst_37 = arith.constant 1.000000e+00 : f32
    %112 = vector.broadcast %cst_37 : f32 to vector<1x1xf32>
    %113 = arith.subf %111, %112 : vector<1x1xf32>
    %cst_38 = arith.constant 5.000000e-01 : f32
    %114 = vector.broadcast %cst_38 : f32 to vector<1x1xf32>
    %115 = arith.mulf %114, %113 : vector<1x1xf32>
    %cst_39 = arith.constant -1.000000e+00 : f32
    %cst_40 = arith.constant 1.000000e+00 : f32
    %116 = vector.broadcast %cst_39 : f32 to vector<1x1xf32>
    %117 = arith.maximumf %116, %115 : vector<1x1xf32>
    %118 = vector.broadcast %cst_40 : f32 to vector<1x1xf32>
    %119 = arith.minimumf %118, %117 : vector<1x1xf32>
    %120 = arith.subf %104, %105 : vector<4x4xf32>
    %121 = arith.mulf %120, %103 : vector<4x4xf32>
    %122 = arith.mulf %121, %121 : vector<4x4xf32>
    %cst_41 = arith.constant dense<0.000000e+00> : vector<4xf32>
    %123 = vector.multi_reduction <add>, %122, %cst_41 [1] : vector<4x4xf32> to vector<4xf32>
    %124 = vector.shape_cast %123 : vector<4xf32> to vector<4x1xf32>
    %cst_42 = arith.constant dense<0.000000e+00> : vector<1xf32>
    %125 = vector.multi_reduction <add>, %124, %cst_42 [0] : vector<4x1xf32> to vector<1xf32>
    %126 = vector.shape_cast %125 : vector<1xf32> to vector<1x1xf32>
    %127 = math.sqrt %126 : vector<1x1xf32>
    %c0_43 = arith.constant 0 : index
    %c0_44 = arith.constant 0 : index
    %128 = vector.load %arg11[%c0_43, %c0_44] : memref<3x64xf32, #tpu.memory_space<vmem>>, vector<1x64xf32>
    %c1_45 = arith.constant 1 : index
    %c0_46 = arith.constant 0 : index
    %129 = vector.load %arg11[%c1_45, %c0_46] : memref<3x64xf32, #tpu.memory_space<vmem>>, vector<1x64xf32>
    %c2_47 = arith.constant 2 : index
    %c0_48 = arith.constant 0 : index
    %130 = vector.load %arg11[%c2_47, %c0_48] : memref<3x64xf32, #tpu.memory_space<vmem>>, vector<1x64xf32>
    %c0_49 = arith.constant 0 : index
    %131 = memref.load %arg1[%c0_49] : memref<16xf32, #tpu.memory_space<smem>>
    %132 = vector.broadcast %131 : f32 to vector<1x64xf32>
    %133 = arith.mulf %132, %128 : vector<1x64xf32>
    %c1_50 = arith.constant 1 : index
    %134 = memref.load %arg1[%c1_50] : memref<16xf32, #tpu.memory_space<smem>>
    %135 = vector.broadcast %134 : f32 to vector<1x64xf32>
    %136 = arith.mulf %135, %129 : vector<1x64xf32>
    %137 = arith.addf %133, %136 : vector<1x64xf32>
    %c2_51 = arith.constant 2 : index
    %138 = memref.load %arg1[%c2_51] : memref<16xf32, #tpu.memory_space<smem>>
    %139 = vector.broadcast %138 : f32 to vector<1x64xf32>
    %140 = arith.mulf %139, %130 : vector<1x64xf32>
    %141 = arith.addf %137, %140 : vector<1x64xf32>
    %c3_52 = arith.constant 3 : index
    %142 = memref.load %arg1[%c3_52] : memref<16xf32, #tpu.memory_space<smem>>
    %143 = vector.broadcast %142 : f32 to vector<1x64xf32>
    %144 = arith.addf %141, %143 : vector<1x64xf32>
    %c4_53 = arith.constant 4 : index
    %145 = memref.load %arg1[%c4_53] : memref<16xf32, #tpu.memory_space<smem>>
    %146 = vector.broadcast %145 : f32 to vector<1x64xf32>
    %147 = arith.mulf %146, %128 : vector<1x64xf32>
    %c5_54 = arith.constant 5 : index
    %148 = memref.load %arg1[%c5_54] : memref<16xf32, #tpu.memory_space<smem>>
    %149 = vector.broadcast %148 : f32 to vector<1x64xf32>
    %150 = arith.mulf %149, %129 : vector<1x64xf32>
    %151 = arith.addf %147, %150 : vector<1x64xf32>
    %c6_55 = arith.constant 6 : index
    %152 = memref.load %arg1[%c6_55] : memref<16xf32, #tpu.memory_space<smem>>
    %153 = vector.broadcast %152 : f32 to vector<1x64xf32>
    %154 = arith.mulf %153, %130 : vector<1x64xf32>
    %155 = arith.addf %151, %154 : vector<1x64xf32>
    %c7_56 = arith.constant 7 : index
    %156 = memref.load %arg1[%c7_56] : memref<16xf32, #tpu.memory_space<smem>>
    %157 = vector.broadcast %156 : f32 to vector<1x64xf32>
    %158 = arith.addf %155, %157 : vector<1x64xf32>
    %c8_57 = arith.constant 8 : index
    %159 = memref.load %arg1[%c8_57] : memref<16xf32, #tpu.memory_space<smem>>
    %160 = vector.broadcast %159 : f32 to vector<1x64xf32>
    %161 = arith.mulf %160, %128 : vector<1x64xf32>
    %c9_58 = arith.constant 9 : index
    %162 = memref.load %arg1[%c9_58] : memref<16xf32, #tpu.memory_space<smem>>
    %163 = vector.broadcast %162 : f32 to vector<1x64xf32>
    %164 = arith.mulf %163, %129 : vector<1x64xf32>
    %165 = arith.addf %161, %164 : vector<1x64xf32>
    %c10_59 = arith.constant 10 : index
    %166 = memref.load %arg1[%c10_59] : memref<16xf32, #tpu.memory_space<smem>>
    %167 = vector.broadcast %166 : f32 to vector<1x64xf32>
    %168 = arith.mulf %167, %130 : vector<1x64xf32>
    %169 = arith.addf %165, %168 : vector<1x64xf32>
    %c11_60 = arith.constant 11 : index
    %170 = memref.load %arg1[%c11_60] : memref<16xf32, #tpu.memory_space<smem>>
    %171 = vector.broadcast %170 : f32 to vector<1x64xf32>
    %172 = arith.addf %169, %171 : vector<1x64xf32>
    %173 = arith.subf %144, %128 : vector<1x64xf32>
    %174 = arith.subf %158, %129 : vector<1x64xf32>
    %175 = arith.subf %172, %130 : vector<1x64xf32>
    %176 = arith.mulf %173, %173 : vector<1x64xf32>
    %177 = arith.mulf %174, %174 : vector<1x64xf32>
    %178 = arith.addf %176, %177 : vector<1x64xf32>
    %179 = arith.mulf %175, %175 : vector<1x64xf32>
    %180 = arith.addf %178, %179 : vector<1x64xf32>
    %181 = math.sqrt %180 : vector<1x64xf32>
    %cst_61 = arith.constant dense<0.000000e+00> : vector<1xf32>
    %182 = vector.multi_reduction <add>, %181, %cst_61 [1] : vector<1x64xf32> to vector<1xf32>
    %183 = vector.shape_cast %182 : vector<1xf32> to vector<1x1xf32>
    %cst_62 = arith.constant 1.562500e-02 : f32
    %184 = vector.broadcast %cst_62 : f32 to vector<1x1xf32>
    %185 = arith.mulf %183, %184 : vector<1x1xf32>
    %cst_63 = arith.constant 2.000000e-01 : f32
    %186 = vector.broadcast %cst_63 : f32 to vector<1x1xf32>
    %187 = arith.cmpf olt, %185, %186 : vector<1x1xf32>
    %188 = arith.extui %187 : vector<1x1xi1> to vector<1x1xi32>
    %189 = arith.sitofp %188 : vector<1x1xi32> to vector<1x1xf32>
    %190 = tpu.iota {dimensions = array<i32: 1>} : vector<1x8xi32>
    %cst_64 = arith.constant 0.000000e+00 : f32
    %191 = vector.broadcast %cst_64 : f32 to vector<1x8xf32>
    %c0_i32 = arith.constant 0 : i32
    %192 = vector.broadcast %c0_i32 : i32 to vector<1x8xi32>
    %193 = arith.cmpi eq, %190, %192 : vector<1x8xi32>
    %194 = vector.shape_cast %23 : vector<1x1xf32> to vector<1x1xf32>
    %195 = vector.broadcast %194 : vector<1x1xf32> to vector<1x8xf32>
    %196 = arith.select %193, %195, %191 : vector<1x8xi1>, vector<1x8xf32>
    %c1_i32 = arith.constant 1 : i32
    %197 = vector.broadcast %c1_i32 : i32 to vector<1x8xi32>
    %198 = arith.cmpi eq, %190, %197 : vector<1x8xi32>
    %199 = vector.shape_cast %87 : vector<1x1xf32> to vector<1x1xf32>
    %200 = vector.broadcast %199 : vector<1x1xf32> to vector<1x8xf32>
    %201 = arith.select %198, %200, %191 : vector<1x8xi1>, vector<1x8xf32>
    %202 = arith.addf %196, %201 : vector<1x8xf32>
    %c2_i32 = arith.constant 2 : i32
    %203 = vector.broadcast %c2_i32 : i32 to vector<1x8xi32>
    %204 = arith.cmpi eq, %190, %203 : vector<1x8xi32>
    %205 = vector.shape_cast %119 : vector<1x1xf32> to vector<1x1xf32>
    %206 = vector.broadcast %205 : vector<1x1xf32> to vector<1x8xf32>
    %207 = arith.select %204, %206, %191 : vector<1x8xi1>, vector<1x8xf32>
    %208 = arith.addf %202, %207 : vector<1x8xf32>
    %c3_i32_65 = arith.constant 3 : i32
    %209 = vector.broadcast %c3_i32_65 : i32 to vector<1x8xi32>
    %210 = arith.cmpi eq, %190, %209 : vector<1x8xi32>
    %211 = vector.shape_cast %127 : vector<1x1xf32> to vector<1x1xf32>
    %212 = vector.broadcast %211 : vector<1x1xf32> to vector<1x8xf32>
    %213 = arith.select %210, %212, %191 : vector<1x8xi1>, vector<1x8xf32>
    %214 = arith.addf %208, %213 : vector<1x8xf32>
    %c4_i32 = arith.constant 4 : i32
    %215 = vector.broadcast %c4_i32 : i32 to vector<1x8xi32>
    %216 = arith.cmpi eq, %190, %215 : vector<1x8xi32>
    %217 = vector.shape_cast %185 : vector<1x1xf32> to vector<1x1xf32>
    %218 = vector.broadcast %217 : vector<1x1xf32> to vector<1x8xf32>
    %219 = arith.select %216, %218, %191 : vector<1x8xi1>, vector<1x8xf32>
    %220 = arith.addf %214, %219 : vector<1x8xf32>
    %c5_i32 = arith.constant 5 : i32
    %221 = vector.broadcast %c5_i32 : i32 to vector<1x8xi32>
    %222 = arith.cmpi eq, %190, %221 : vector<1x8xi32>
    %223 = vector.shape_cast %189 : vector<1x1xf32> to vector<1x1xf32>
    %224 = vector.broadcast %223 : vector<1x1xf32> to vector<1x8xf32>
    %225 = arith.select %222, %224, %191 : vector<1x8xi1>, vector<1x8xf32>
    %226 = arith.addf %220, %225 : vector<1x8xf32>
    %c0_66 = arith.constant 0 : index
    %c0_67 = arith.constant 0 : index
    %227 = vector.load %arg12[%c0_66, %c0_67] : memref<1x8xf32, #tpu.memory_space<vmem>>, vector<1x8xf32>
    tpu.vector_store %arg12[%c0_66, %c0_67], %226 {strides = array<i32>} : memref<1x8xf32, #tpu.memory_space<vmem>>, vector<1x8xf32>,
    return
  }
}

</mosaic_0001>

<bundles_post_ra>
// kernel: _fused_metrics.1
= control target key start
LH: loop header
LB: loop body
LE: loop exit
PB: predicated region body
PF: predicated region fallthrough
CT: control target
= control target key end

     0   :  { %17 = vsyncpa [#allocation3], 0  ;;  %s610_s0 = inlined_call_operand.vmem [shape: f32[16], index: 0, kind: input, shape index: {}]   ;;  %s611_s1 = inlined_call_operand.vmem [shape: f32[16], index: 1, kind: input, shape index: {}]   ;;  %s612_s2 = inlined_call_operand.vmem [shape: f32[4,4], index: 2, kind: input, shape index: {}]   ;;  %s613_s3 = inlined_call_operand.vmem [shape: f32[4,4], index: 3, kind: input, shape index: {}]   ;;  %s614_s4 = inlined_call_operand.vmem [shape: s32[24,1], index: 4, kind: input, shape index: {}]   ;;  %s615_s5 = inlined_call_operand.vmem [shape: s32[24,1], index: 5, kind: input, shape index: {}]   ;;  %s616_s6 = inlined_call_operand.vmem [shape: f32[24,1], index: 6, kind: input, shape index: {}]   ;;  %s617_s7 = inlined_call_operand.vmem [shape: s32[1,16], index: 7, kind: input, shape index: {}]   ;;  %s618_s8 = inlined_call_operand.vmem [shape: s32[1,16], index: 8, kind: input, shape index: {}]   ;;  %s619_s9 = inlined_call_operand.vmem [shape: f32[3,32], index: 9, kind: input, shape index: {}]   ;;  %s620_s10 = inlined_call_operand.vmem [shape: f32[3,32], index: 10, kind: input, shape index: {}]   ;;  %s621_s11 = inlined_call_operand.vmem [shape: f32[3,64], index: 11, kind: input, shape index: {}]   ;;  %s622_s12 = inlined_call_operand.vmem [shape: f32[1,8], index: 12, kind: output, shape index: {}]  }
   0x1   :  { %s25_s23 = sshll.u32 %s610_s0, 4  ;;  %s26_s23 = int_to_ptr.vmem [resolvable:$true] %s25_s23 }
   0x2   :  { %18 = vsyncpa [#allocation5], 0  ;;  %s35_s26 = sshll.u32 %s611_s1, 4  ;;  %s407_s27 = scalar_lea.vmem %s26_s23, 16  ;;  %s36_s26 = int_to_ptr.vmem [resolvable:$true] %s35_s26 }
   0x3   :  { %p408_p0 = scmp.ne.s32.totalorder %s26_s23, %s407_s27  ;;  %p412_p1 = scmp.lt.s32.totalorder %s26_s23, %s26_s23 }
   0x4   :  { %p413_p2 = scmp.lt.s32.totalorder %s407_s27, %s407_s27 }
   0x6   :  { %p414_p3 = por %p413_p2, %p412_p1 }
   0x8   :  { %p415_p4 = pnand %p414_p3, %p408_p0 }
   0xa   :  { %418 = shalt.err (!%p415_p4)
}
   0xb   :  { %s435_s28 = smov [#allocation2]   ;;  %s419_s29 = scalar_lea.vmem %s36_s26, 16 }
   0xc   :  { %28 = dma.vmem_to_smem %s26_s23, 16, %s435_s28, [#allocation3]  }
   0xd   :  { %p420_p5 = scmp.ne.s32.totalorder %s36_s26, %s419_s29  ;;  %p424_p6 = scmp.lt.s32.totalorder %s36_s26, %s36_s26 }
   0xe   :  { %p425_p7 = scmp.lt.s32.totalorder %s419_s29, %s419_s29 }
  0x10   :  { %p426_p8 = por %p425_p7, %p424_p6 }
  0x12   :  { %p427_p9 = pnand %p426_p8, %p420_p5 }
  0x14   :  { %430 = shalt.err (!%p427_p9)
}
  0x15   :  { %s436_s0 = smov [#allocation4]  }
  0x16   :  { %38 = dma.vmem_to_smem %s36_s26, 16, %s436_s0, [#allocation5]  }
  0x17   :  { %431 = dma.done.wait [#allocation3], 16  }
  0x18   :  { %432 = vsyncadd [#allocation3], 4294967280 }
  0x19   :  { %433 = dma.done.wait [#allocation5], 16  }
  0x1a   :  { %434 = vsyncadd [#allocation5], 4294967280 }
  0x1b   :  { %65 = sfence }
  0x1c   :  { %v92_v0 = vld [vmem:[%s615_s5] sm:$0xff]  ;;  %v437_v2 = vmov 0   ;;  %v67_v3 = vld [vmem:[%s616_s6 + $0x8] sm:$0xff]  ;;  %v68_v9 = vld [vmem:[%s616_s6 + $0x10] sm:$0xff]  ;;  %s161_s29 = sld [smem:[#allocation2]]  ;;  %s369_s0 = sld [smem:[#allocation2 + $0x1]]  ;;  %v222_v13 = vlaneseq }
  0x1d   :  { %v72_v1 = vld [vmem:[%s614_s4] sm:$0xff]  ;;  %402 = vset.pattern.permute.xlu1 %v437_v2  ;;  %401 = vset.pattern.permute.xlu0 %v437_v2  ;;  %v93_v5 = vld [vmem:[%s615_s5 + $0x8] sm:$0xff]  ;;  %vm70_vm0 = vcmp.gt.f32.partialorder %v67_v3, 0.1  ;;  %v94_v10 = vld [vmem:[%s615_s5 + $0x10] sm:$0xff]  ;;  %s372_s1 = sld [smem:[#allocation2 + $0x4]] }
  0x1e   :  { %v66_v4 = vld [vmem:[%s616_s6] sm:$0xff]  ;;  %97 = vperm.xlu1 %402, %v92_v0   ;;  %77 = vperm.xlu0 %401, %v72_v1   ;;  %v73_v6 = vld [vmem:[%s614_s4 + $0x8] sm:$0xff]  ;;  %v116_v7 = vsel %vm70_vm0, 1, %v437_v2  ;;  %v74_v11 = vld [vmem:[%s614_s4 + $0x10] sm:$0xff]  ;;  %vm71_vm2 = vcmp.gt.f32.partialorder %v68_v9, 0.1 }
  0x1f   :  { %vm69_vm1 = vcmp.gt.f32.partialorder %v66_v4, 0.1  ;;  %v117_v12 = vsel %vm71_vm2, 1, %v437_v2  ;;  %s373_s30 = sld [smem:[#allocation2 + $0x5]]  ;;  %s370_s6 = sld [smem:[#allocation2 + $0x2]]  ;;  %v223_v38 = vshrl.u32 %v222_v13, 7 }
  0x20   :  { %v115_v8 = vsel %vm69_vm1, 1, %v437_v2  ;;  %s374_s13 = sld [smem:[#allocation2 + $0x6]]  ;;  %s376_s14 = sld [smem:[#allocation2 + $0x8]]  ;;  %v158_v14 = vld [vmem:[%s620_s10] sm:$0x1]  ;;  %v551_v39 = vand.u32 127, %v222_v13 }
  0x21   :  { %s377_s15 = sld [smem:[#allocation2 + $0x9]]  ;;  %s378_s16 = sld [smem:[#allocation2 + $0xa]]  ;;  %v159_v15 = vld [vmem:[%s620_s10 + $0x1] sm:$0x1]  ;;  %v160_v22 = vld [vmem:[%s620_s10 + $0x2] sm:$0x1] }
  0x22   :  { %100 = vperm.xlu1 %402, %v93_v5   ;;  %80 = vperm.xlu0 %401, %v73_v6   ;;  %v162_v16 = vstv %s161_s29  ;;  %v165_v17 = vstv %s369_s0  ;;  %s371_s19 = sld [smem:[#allocation2 + $0x3]]  ;;  %s375_s20 = sld [smem:[#allocation2 + $0x7]]  ;;  %v203_v42 = vld [vmem:[%s619_s9] sm:$0x1]  ;;  %v205_v46 = vld [vmem:[%s619_s9 + $0x1] sm:$0x1] }
  0x23   :  { %v163_v18 = vmul.f32 %v162_v16, %v158_v14  ;;  %v166_v19 = vmul.f32 %v165_v17, %v159_v15  ;;  %v176_v20 = vstv %s372_s1  ;;  %s379_s23 = sld [smem:[#allocation2 + $0xb]]  ;;  %vm226_vm3 = vcmp.lt.s32.totalorder %v223_v38, 3  ;;  %v207_v52 = vld [vmem:[%s619_s9 + $0x2] sm:$0x1]  ;;  %s388_s9 = sld [smem:[#allocation4 + $0x4]] }
  0x24   :  { %v177_v24 = vmul.f32 %v176_v20, %v158_v14  ;;  %vm231_vm4 = vcmp.eq.s32.totalorder %v551_v39, 3  ;;  %v235_v54 = vld [vmem:[%s612_s2] sm:$0xf]  ;;  %vm227_vm6 = vcmp.lt.s32.totalorder %v551_v39, 3  ;;  %v438_v60 = vmov 0.0   ;;  %s278_s2 = sld [smem:[#allocation4]] }
  0x25   :  { %v179_v21 = vstv %s373_s30  ;;  %v169_v23 = vstv %s370_s6  ;;  %v167_v27 = vadd.f32 %v166_v19, %v163_v18  ;;  %v236_v55 = vld [vmem:[%s613_s3] sm:$0xf]  ;;  %vm232_vm5 = vmand %vm226_vm3, %vm231_vm4  ;;  %vm239_vm8 = vcmask 27648   ;;  %s385_s3 = sld [smem:[#allocation4 + $0x1]]  ;;  %s389_s6 = sld [smem:[#allocation4 + $0x5]] }
  0x26   :  { %122 = vperm.xlu1 %402, %v116_v7   ;;  %119 = vperm.xlu0 %401, %v115_v8   ;;  %v180_v25 = vmul.f32 %v179_v21, %v159_v15  ;;  %v183_v26 = vstv %s374_s13  ;;  %v170_v28 = vmul.f32 %v169_v23, %v160_v22  ;;  %v190_v30 = vstv %s376_s14  ;;  %vm228_vm7 = vmand %vm226_vm3, %vm227_vm6  ;;  %s386_s13 = sld [smem:[#allocation4 + $0x2]]  ;;  %s390_s14 = sld [smem:[#allocation4 + $0x6]]  ;;  %v277_v19 = vld [vmem:[%s621_s11 + $0x2] sm:$0x1] }
  0x27   :  { %v184_v29 = vmul.f32 %v183_v26, %v160_v22  ;;  %v191_v32 = vmul.f32 %v190_v30, %v158_v14  ;;  %v193_v33 = vstv %s377_s15  ;;  %v197_v34 = vstv %s378_s16  ;;  %s392_s15 = sld [smem:[#allocation4 + $0x8]]  ;;  %s393_s16 = sld [smem:[#allocation4 + $0x9]] }
  0x28   :  { %v181_v31 = vadd.f32 %v180_v25, %v177_v24  ;;  %v171_v35 = vadd.f32 %v170_v28, %v167_v27  ;;  %v194_v36 = vmul.f32 %v193_v33, %v159_v15  ;;  %v198_v37 = vmul.f32 %v197_v34, %v160_v22  ;;  %s387_s22 = sld [smem:[#allocation4 + $0x3]] }
  0x29   :  { %v173_v40 = vstv %s371_s19  ;;  %v187_v44 = vstv %s375_s20  ;;  %v201_v48 = vstv %s379_s23  ;;  %v255_v59 = vsub.f32 %v235_v54, %v236_v55  ;;  %s394_s19 = sld [smem:[#allocation4 + $0xa]]  ;;  %s391_s23 = sld [smem:[#allocation4 + $0x7]] }
  0x2a   :  { %103 = vperm.xlu1 %402, %v94_v10   ;;  %83 = vperm.xlu0 %401, %v74_v11   ;;  %v185_v41 = vadd.f32 %v184_v29, %v181_v31  ;;  %v174_v43 = vadd.f32 %v173_v40, %v171_v35  ;;  %v195_v45 = vadd.f32 %v194_v36, %v191_v32  ;;  %v382_v61 = vsel %vm232_vm5, 1.0, %v438_v60  ;;  %v275_v11 = vld [vmem:[%s621_s11] sm:$0x1]  ;;  %s395_s10 = sld [smem:[#allocation4 + $0xb]] }
  0x2b   :  { %v237_v0 = vmul.f32 %v236_v55, %v235_v54  ;;  %v256_v1 = vmul.f32 %v382_v61, %v255_v59  ;;  %v381_v3 = vsel %vm228_vm7, 1.0, %v438_v60  ;;  %vm217_vm10 = vcmask 253952  }
  0x2c   :  { %v188_v47 = vadd.f32 %v187_v44, %v185_v41  ;;  %v199_v49 = vadd.f32 %v198_v37, %v195_v45  ;;  %v204_v50 = vsub.f32 %v203_v42, %v174_v43  ;;  %v279_v13 = vstv %s278_s2 }
  0x2d   :  { %v238_v5 = vmul.f32 %v381_v3, %v237_v0  ;;  %v257_v6 = vmul.f32 %v256_v1, %v256_v1  ;;  %v282_v14 = vstv %s385_s3  ;;  %v293_v15 = vstv %s388_s9 }
  0x2e   :  { %125 = vperm.xlu0 %401, %v117_v12   ;;  %v206_v51 = vsub.f32 %v205_v46, %v188_v47  ;;  %v202_v53 = vadd.f32 %v201_v48, %v199_v49  ;;  %v209_v57 = vmul.f32 %v204_v50, %v204_v50  ;;  %v276_v12 = vld [vmem:[%s621_s11 + $0x1] sm:$0x1]  ;;  %v296_v16 = vstv %s389_s6  ;;  %v368_v49 = vld [vmem:[%s618_s8] ss:$0 sm:$0xff] }
  0x2f   :  { %v240_v7 = vsel %vm239_vm8, %v238_v5, 0.0  ;;  %v258_v8 = vsel %vm239_vm8, %v257_v6, 0.0  ;;  %v280_v17 = vmul.f32 %v279_v13, %v275_v11  ;;  %v283_v18 = vmul.f32 %v282_v14, %v276_v12  ;;  %v367_v50 = vld [vmem:[%s617_s7] ss:$0 sm:$0xff] }
  0x30   :  { %v208_v56 = vsub.f32 %v207_v52, %v202_v53  ;;  %v210_v58 = vmul.f32 %v206_v51, %v206_v51  ;;  %v286_v20 = vstv %s386_s13  ;;  %v294_v21 = vmul.f32 %v293_v15, %v275_v11 }
  0x31   :  { %v297_v22 = vmul.f32 %v296_v16, %v276_v12  ;;  %v300_v23 = vstv %s390_s14  ;;  %v307_v24 = vstv %s392_s15  ;;  %v310_v25 = vstv %s393_s16 }
  0x32   :  { %v211_v62 = vadd.f32 %v210_v58, %v209_v57  ;;  %v212_v63 = vmul.f32 %v208_v56, %v208_v56  ;;  %v284_v26 = vadd.f32 %v283_v18, %v280_v17  ;;  %v287_v27 = vmul.f32 %v286_v20, %v277_v19 }
  0x33   :  { %v298_v28 = vadd.f32 %v297_v22, %v294_v21  ;;  %v301_v29 = vmul.f32 %v300_v23, %v277_v19  ;;  %v308_v30 = vmul.f32 %v307_v24, %v275_v11  ;;  %v311_v31 = vmul.f32 %v310_v25, %v276_v12 }
  0x34   :  { %v213_v4 = vadd.f32 %v212_v63, %v211_v62  ;;  %v314_v32 = vstv %s394_s19  ;;  %v288_v33 = vadd.f32 %v287_v27, %v284_v26  ;;  %v290_v37 = vstv %s387_s22 }
  0x35   :  { %v302_v34 = vadd.f32 %v301_v29, %v298_v28  ;;  %v312_v35 = vadd.f32 %v311_v31, %v308_v30  ;;  %v315_v36 = vmul.f32 %v314_v32, %v277_v19  ;;  %v304_v38 = vstv %s391_s23 }
  0x36   :  { %vm214_vm9 = vcmp.lt.f32.partialorder %v213_v4, 0.01  ;;  %v291_v40 = vadd.f32 %v290_v37, %v288_v33  ;;  %v318_v43 = vstv %s395_s10  ;;  %vm136_vm5 = vcmask 130048  }
  0x37   :  { %v380_v9 = vsel %vm214_vm9, 1.0, %v438_v60  ;;  %v305_v41 = vadd.f32 %v304_v38, %v302_v34  ;;  %v316_v42 = vadd.f32 %v315_v36, %v312_v35 }
  0x38   :  { %v218_v10 = vsel %vm217_vm10, %v380_v9, 0.0  ;;  %v320_v47 = vsub.f32 %v291_v40, %v275_v11 }
  0x39   :  { %v319_v46 = vadd.f32 %v318_v43, %v316_v42  ;;  %v321_v48 = vsub.f32 %v305_v41, %v276_v12 }
  0x3a   :  { %v323_v54 = vmul.f32 %v320_v47, %v320_v47 }
  0x3b   :  { %v322_v53 = vsub.f32 %v319_v46, %v277_v19  ;;  %v324_v55 = vmul.f32 %v321_v48, %v321_v48 }
  0x3d   :  { %v325_v58 = vadd.f32 %v324_v55, %v323_v54  ;;  %v326_v59 = vmul.f32 %v322_v53, %v322_v53 }
  0x3f   :  { %v327_v1 = vadd.f32 %v326_v59, %v325_v58 }
  0x41   :  { %403 = vrsqrt.f32 %v327_v1  ;;  %v333_v17 = vand.u32 2147483648, %v327_v1 }
  0x4b   :  { %v404_v11 = vpop.eup %403 }
  0x4c   :  { %v329_v14 = vmul.f32 %v404_v11, %v327_v1 }
  0x4d   :  { %241 = vadd.xlane.f32.xlu0 %v240_v7 }
  0x4e   :  { %259 = vadd.xlane.f32.xlu1 %v258_v8 }
  0x52   :  { %219 = vadd.xlane.f32.xlu1 %v218_v10 }
  0x9d   :  { %v98_v44 = vpop.permute.xlu1 %97  ;;  %v78_v45 = vpop.permute.xlu0 %77 }
  0x9e   :  { %vm109_vm11 = vcmp.eq.s32.totalorder %v98_v44, %v368_v49  ;;  %vm89_vm12 = vcmp.eq.s32.totalorder %v78_v45, %v367_v50 }
  0x9f   :  { %vm112_vm15 = vmand %vm89_vm12, %vm109_vm11 }
  0xa1   :  { %v101_v51 = vpop.permute.xlu1 %100  ;;  %v81_v52 = vpop.permute.xlu0 %80 }
  0xa2   :  { %vm110_vm13 = vcmp.eq.s32.totalorder %v101_v51, %v368_v49  ;;  %vm90_vm14 = vcmp.eq.s32.totalorder %v81_v52, %v367_v50 }
  0xa3   :  { %vm113_vm0 = vmand %vm90_vm14, %vm110_vm13 }
  0xa5   :  { %v123_v56 = vpop.permute.xlu1 %122  ;;  %v120_v57 = vpop.permute.xlu0 %119 }
  0xa6   :  { %vm128_vm1 = vcmp.eq.s32.totalorder %v123_v56, 1  ;;  %vm127_vm2 = vcmp.eq.s32.totalorder %v120_v57, 1 }
  0xa7   :  { %vm131_vm3 = vmand %vm113_vm0, %vm128_vm1  ;;  %vm330_vm0 = vcmp.eq.f32.partialorder %v327_v1, inf }
  0xa8   :  { %v134_v61 = vsel %vm131_vm3, 1, %v437_v2  ;;  %vm130_vm6 = vmand %vm112_vm15, %vm127_vm2  ;;  %v331_v18 = vsel %vm330_vm0, %v327_v1, %v329_v14  ;;  %vm332_vm2 = vcmp.eq.f32.partialorder %v327_v1, 0.0  ;;  %vm335_vm3 = vcmask 516096  }
  0xa9   :  { %v133_v62 = vsel %vm130_vm6, 1, %v437_v2  ;;  %v104_v63 = vpop.permute.xlu1 %103  ;;  %v84_v0 = vpop.permute.xlu0 %83  ;;  %v138_v3 = vsel %vm136_vm5, %v134_v61, 2147483648  ;;  %v334_v20 = vsel %vm332_vm2, %v333_v17, %v331_v18  ;;  %vm243_vm6 = vcmask 1043456  }
  0xaa   :  { %v137_v4 = vsel %vm136_vm5, %v133_v62, 2147483648  ;;  %vm111_vm7 = vcmp.eq.s32.totalorder %v104_v63, %v368_v49  ;;  %vm91_vm8 = vcmp.eq.s32.totalorder %v84_v0, %v367_v50  ;;  %v336_v22 = vsel %vm335_vm3, %v334_v20, 0.0 }
  0xab   :  { %vm140_vm9 = vcmp.gt.s32.totalorder %v137_v4, %v138_v3  ;;  %vm114_vm10 = vmand %vm91_vm8, %vm111_vm7  ;;  %vm343_vm8 = vcmp.eq.s32.totalorder %v551_v39, 0 }
  0xac   :  { %v141_v7 = vsel %vm140_vm9, %v137_v4, %v138_v3 }
  0xad   :  { %v126_v5 = vpop.permute.xlu0 %125 }
  0xae   :  { %vm129_vm11 = vcmp.eq.s32.totalorder %v126_v5, 1 }
  0xaf   :  { %vm132_vm12 = vmand %vm114_vm10, %vm129_vm11  ;;  %vm348_vm10 = vcmp.eq.s32.totalorder %v551_v39, 2  ;;  %vm353_vm11 = vcmp.eq.s32.totalorder %v551_v39, 4 }
  0xb0   :  { %v135_v6 = vsel %vm132_vm12, 1, %v437_v2  ;;  %vm356_vm12 = vcmp.eq.s32.totalorder %v551_v39, 5 }
  0xb1   :  { %v139_v8 = vsel %vm136_vm5, %v135_v6, 2147483648 }
  0xb2   :  { %vm142_vm13 = vcmp.gt.s32.totalorder %v141_v7, %v139_v8 }
  0xb3   :  { %v143_v9 = vsel %vm142_vm13, %v141_v7, %v139_v8 }
  0xb4   :  { %v144_v10 = vrot.slane %v143_v9, 4 }
  0xb6   :  { %vm145_vm14 = vcmp.gt.s32.totalorder %v143_v9, %v144_v10 }
  0xb7   :  { %v146_v12 = vsel %vm145_vm14, %v143_v9, %v144_v10  ;;  %vm359_vm14 = vcmask 57344  }
  0xb8   :  { %v147_v13 = vrot.slane %v146_v12, 2 }
  0xba   :  { %vm148_vm15 = vcmp.gt.s32.totalorder %v146_v12, %v147_v13 }
  0xbb   :  { %v149_v15 = vsel %vm148_vm15, %v146_v12, %v147_v13 }
  0xbc   :  { %v150_v16 = vrot.slane %v149_v15, 1 }
  0xbe   :  { %vm151_vm1 = vcmp.gt.s32.totalorder %v149_v15, %v150_v16 }
  0xbf   :  { %v152_v2 = vsel %vm151_vm1, %v149_v15, %v150_v16 }
  0xc0   :  { %v153_v19 = vcvt.s32.f32 %v152_v2 }
  0xc2   :  { %v154_v21 = vsel %vm136_vm5, %v153_v19, 0.0  ;;  %vm345_vm5 = vcmp.eq.s32.totalorder %v551_v39, 1 }
  0xc3   :  { %155 = vadd.xlane.f32.xlu0 %v154_v21 }
  0xc7   :  { %337 = vadd.xlane.f32.xlu0 %v336_v22 }
  0xda   :  { %v242_v26 = vpop.xlane.xlu0 %241 }
  0xdb   :  { %v260_v23 = vpop.xlane.xlu1 %259  ;;  %v244_v28 = vsel %vm243_vm6, %v242_v26, 0.0 }
  0xdc   :  { %v261_v24 = vsel %vm243_vm6, %v260_v23, 0.0  ;;  %v245_v30 = vrot.slane %v244_v28, 4 }
  0xdd   :  { %v262_v25 = vrot.slane %v261_v24, 4 }
  0xde   :  { %v246_v32 = vadd.f32 %v245_v30, %v244_v28 }
  0xdf   :  { %v263_v27 = vadd.f32 %v262_v25, %v261_v24  ;;  %v220_v41 = vpop.xlane.xlu1 %219 }
  0xe0   :  { %v247_v34 = vrot.slane %v246_v32, 2  ;;  %v221_v43 = vmul.f32 0.03125, %v220_v41 }
  0xe1   :  { %v264_v29 = vrot.slane %v263_v27, 2 }
  0xe2   :  { %v248_v36 = vadd.f32 %v247_v34, %v246_v32  ;;  %v346_v46 = vsel %vm345_vm5, %v221_v43, 0.0 }
  0xe3   :  { %v265_v31 = vadd.f32 %v264_v29, %v263_v27 }
  0xe4   :  { %v249_v37 = vrot.slane %v248_v36, 1 }
  0xe5   :  { %v266_v33 = vrot.slane %v265_v31, 1 }
  0xe6   :  { %v250_v38 = vadd.f32 %v249_v37, %v248_v36 }
  0xe7   :  { %v267_v35 = vadd.f32 %v266_v33, %v265_v31 }
  0xe8   :  { %v383_v40 = vadd.f32 -1.0, %v250_v38 }
  0xe9   :  { %405 = vrsqrt.f32 %v267_v35  ;;  %vm270_vm7 = vcmp.eq.f32.partialorder %v267_v35, inf  ;;  %v273_v48 = vand.u32 2147483648, %v267_v35  ;;  %vm272_vm9 = vcmp.eq.f32.partialorder %v267_v35, 0.0 }
  0xea   :  { %v252_v44 = vmul.f32 0.5, %v383_v40 }
  0xec   :  { %v384_v49 = vclamps-f32 %v252_v44, 1.0 }
  0xee   :  { %v349_v56 = vsel %vm348_vm10, %v384_v49, 0.0 }
  0xf3   :  { %v406_v42 = vpop.eup %405 }
  0xf4   :  { %v269_v45 = vmul.f32 %v406_v42, %v267_v35 }
  0xf6   :  { %v271_v51 = vsel %vm270_vm7, %v267_v35, %v269_v45 }
  0xf7   :  { %v274_v54 = vsel %vm272_vm9, %v273_v48, %v271_v51 }
  0xf8   :  { %v351_v59 = vsel %vm231_vm4, %v274_v54, 0.0 }
 0x150   :  { %v156_v47 = vpop.xlane.xlu0 %155 }
 0x151   :  { %v157_v50 = vmul.f32 0.0625, %v156_v47 }
 0x153   :  { %v344_v52 = vsel %vm343_vm8, %v157_v50, 0.0 }
 0x154   :  { %v347_v53 = vadd.f32 %v346_v46, %v344_v52  ;;  %v338_v55 = vpop.xlane.xlu0 %337 }
 0x155   :  { %v339_v57 = vmul.f32 0.015625, %v338_v55 }
 0x156   :  { %v350_v58 = vadd.f32 %v349_v56, %v347_v53 }
 0x157   :  { %vm340_vm13 = vcmp.lt.f32.partialorder %v339_v57, 0.2  ;;  %v354_v61 = vsel %vm353_vm11, %v339_v57, 0.0 }
 0x158   :  { %v352_v62 = vadd.f32 %v351_v59, %v350_v58  ;;  %v396_v63 = vsel %vm340_vm13, 1.0, %v438_v60 }
 0x159   :  { %v357_v0 = vsel %vm356_vm12, %v396_v63, 0.0 }
 0x15a   :  { %v355_v1 = vadd.f32 %v354_v61, %v352_v62 }
 0x15c   :  { %v358_v3 = vadd.f32 %v357_v0, %v355_v1 }
 0x15e   :  { %360 = vst.msk [vmem:[%s622_s12] sm:$0x1] %vm359_vm14, %v358_v3 }
 0x15f   :  { %365 = vsyncpa [#allocation3], 1 }
 0x160   :  { %366 = vsyncpa [#allocation5], 1 }

</bundles_post_ra>
